<compile_context>
chip_gen: v7x
topology: tpu7x:2x2x1
jax: 0.10.0
libtpu: 0.0.40
codegen_flags: <defaults>
</compile_context>

<pallas_src>
import jax
import jax.numpy as jnp
from jax.experimental import pallas as pl
from jax.experimental.pallas import tpu as pltpu

_LANE = 128
_COL_CANDIDATES = (4096, 2048, 1024, 512, 256, 128)   # wide, lane-dense slabs


def _relu_kernel(x_ref, o_ref):
    # Elementwise hot path: clamp(min=0) == max(x, 0) on the VPU.  The kernel
    # is DMA-bound on every generation -- no compute-side tricks are needed.
    o_ref[...] = jnp.maximum(x_ref[...], jnp.zeros((), dtype=o_ref.dtype))


def _sublane(dtype):
    # f32 -> 8 rows per vreg; sub-32-bit dtypes pack along sublanes
    # (bf16 -> 16, int8/fp8 -> 32).  Keeps row-tiles vreg-aligned per dtype.
    return max(8, 32 // dtype.itemsize)


def _choose_cols(n):
    for c in _COL_CANDIDATES:
        if n % c == 0:
            return c
    return None


def _hw_budget():
    """Generation-aware (per-buffer tile bytes, scoped VMEM limit bytes)."""
    vmem_bytes = 64 << 20            # conservative fallback (v7x per-TC VMEM)
    try:
        vmem_bytes = int(pltpu.get_tpu_info().vmem_capacity_bytes)
    except Exception:
        pass
    if vmem_bytes <= (64 << 20):
        # v7x-class: fastest HBM (fixed per-step overhead hurts most) but only
        # 64 MiB VMEM per TC -> big tiles, limit kept well under physical.
        return 8 << 20, 48 << 20
    # v5e/v6e: 128 MiB physical VMEM, slower HBM -> 4 MiB tiles already push
    # the ~0.35 us/step overhead below ~5%; raise the 16/32 MiB scoped default.
    return 4 << 20, 64 << 20


def _relu_2d(x2d, tile_r, *, vmem_limit_bytes, donate=False):
    rows, cols = x2d.shape
    itemsize = x2d.dtype.itemsize
    n_blocks = (rows + tile_r - 1) // tile_r

    in_spec_kwargs = {}
    if n_blocks >= 3:
        # Deeper input buffering only pays off (and only allocates) when the
        # grid is long enough for prefetch depth to matter.
        in_spec_kwargs["pipeline_mode"] = pl.Buffered(3)

    return pl.pallas_call(
        _relu_kernel,
        out_shape=jax.ShapeDtypeStruct((rows, cols), x2d.dtype),
        grid_spec=pltpu.PrefetchScalarGridSpec(
            num_scalar_prefetch=0,
            grid=(n_blocks,),
            in_specs=[pl.BlockSpec((tile_r, cols), lambda i: (i, 0),
                                   **in_spec_kwargs)],
            out_specs=pl.BlockSpec((tile_r, cols), lambda i: (i, 0)),
        ),
        compiler_params=pltpu.CompilerParams(
            # TODO(synk): on v7x, if a trace shows one TensorCore idle, switch
            # this axis to pltpu.CORE_PARALLEL (or shard via core_map).
            dimension_semantics=("parallel",),
            vmem_limit_bytes=vmem_limit_bytes,
        ),
        # Advise XLA's scheduler this custom call is a large memory-bound region.
        cost_estimate=pl.CostEstimate(
            flops=rows * cols,
            transcendentals=0,
            bytes_accessed=2 * rows * cols * itemsize,
        ),
        # Optional in-place update; only beneficial when the caller actually
        # donates the input buffer under jit (donate_argnums) -- otherwise XLA
        # inserts a defensive copy (an extra full HBM pass).
        input_output_aliases=({0: 0} if donate else {}),
    )(x2d)


def _relu_flat_aligned(x_flat, n, *, tile_bytes, vmem_limit_bytes, donate):
    """ReLU on a flat array whose length n is a multiple of 128 (no pad/copy)."""
    dtype = x_flat.dtype
    cols = _choose_cols(n)
    assert cols is not None
    rows = n // cols

    sub = _sublane(dtype)
    # Largest sublane-aligned row-tile within the per-buffer byte budget.
    cap = max(sub, (tile_bytes // (cols * dtype.itemsize)) // sub * sub)
    tile_r = rows if rows <= cap else cap   # rows<=cap: block == full dim (legal)

    out2d = _relu_2d(x_flat.reshape(rows, cols), tile_r,
                     vmem_limit_bytes=vmem_limit_bytes, donate=donate)
    return out2d.reshape(-1)


def unigrad_forward(x, *, min_kernel_bytes=2 << 20, donate_input=False,
                    tile_bytes=None, vmem_limit_bytes=None):
    """Forward of UniGrad (== R_LeakyReLU_ReLU.forward == clamp(min=0))."""
    dtype = x.dtype
    n_elem = x.size

    # Tiny tensors: pallas_call launch + per-step overhead dominates a
    # 2-bytes-per-element op; XLA's fused elementwise is strictly better.
    # (Real fix for small activations: fuse the ReLU into its producer op.)
    if n_elem == 0 or n_elem * dtype.itemsize < min_kernel_bytes:
        return jnp.maximum(x, jnp.zeros((), dtype))

    # Element count not a multiple of 128 (rare for conv activations): a
    # slice + concatenate tail path would cost ~3x HBM traffic, so the plain
    # XLA maximum (1x traffic, already at roofline) is strictly better.
    if n_elem % _LANE != 0:
        return jnp.maximum(x, jnp.zeros((), dtype))

    default_tile, default_limit = _hw_budget()
    tile_bytes = default_tile if tile_bytes is None else tile_bytes
    vmem_limit_bytes = (default_limit if vmem_limit_bytes is None
                        else vmem_limit_bytes)

    out_flat = _relu_flat_aligned(
        x.reshape(-1), n_elem,
        tile_bytes=tile_bytes, vmem_limit_bytes=vmem_limit_bytes,
        donate=donate_input)
    return out_flat.reshape(x.shape)


if __name__ == "__main__":
    key = jax.random.PRNGKey(0)

    # Small NCHW activation consistent with the module's forward.
    x = jax.random.normal(key, (2, 4, 16, 16), dtype=jnp.float32)
    out = jax.block_until_ready(unigrad_forward(x, min_kernel_bytes=0))
    ref = jnp.maximum(x, 0.0)
    assert out.shape == x.shape and out.dtype == x.dtype
    assert jnp.array_equal(out, ref), "mismatch vs reference ReLU (f32)"

    # bf16: exercises dtype-aware sublane alignment.
    xb = jax.random.normal(jax.random.PRNGKey(1), (2, 4, 16, 16)).astype(jnp.bfloat16)
    outb = jax.block_until_ready(unigrad_forward(xb, min_kernel_bytes=0))
    assert outb.dtype == jnp.bfloat16 and outb.shape == xb.shape
    assert jnp.array_equal(outb, jnp.maximum(xb, jnp.zeros((), jnp.bfloat16)))

    # Non-128-multiple element count: whole tensor via the 1x-traffic XLA path.
    xt = jax.random.normal(jax.random.PRNGKey(2), (2, 3, 5, 7), dtype=jnp.float32)
    outt = jax.block_until_ready(unigrad_forward(xt, min_kernel_bytes=0))
    assert jnp.array_equal(outt, jnp.maximum(xt, 0.0))

    # Multi-step grid with a partial final block + 3-deep input buffering:
    # force a tiny per-buffer tile so a small tensor spans >= 3 grid steps.
    xp = jax.random.normal(jax.random.PRNGKey(3), (1, 27, 8, 16), dtype=jnp.float32)
    outp = jax.block_until_ready(
        unigrad_forward(xp, min_kernel_bytes=0, tile_bytes=4096))
    assert jnp.array_equal(outp, jnp.maximum(xp, 0.0))

    # Medium tensor on the default (generation-aware) tile budget.
    xm = jax.random.normal(jax.random.PRNGKey(4), (4, 32, 56, 56), dtype=jnp.float32)
    outm = jax.block_until_ready(unigrad_forward(xm, min_kernel_bytes=0))
    assert jnp.array_equal(outm, jnp.maximum(xm, 0.0))

    print("KERNEL_OK")
</pallas_src>

<mosaic_0001>
module attributes {stable_mosaic.version = 11 : i64} {
  func.func @_relu_kernel(%arg0: i32, %arg1: memref<1x2048xf32, #tpu.memory_space<vmem>>, %arg2: memref<1x2048xf32, #tpu.memory_space<vmem>>) attributes {dimension_semantics = [#tpu.dimension_semantics<parallel>], iteration_bounds = array<i64: 1>, scalar_prefetch = 0 : i64, scratch_operands = 0 : i64, tpu.core_type = #tpu.core_type<tc>, window_params = [{transform_indices = @transform_0, window_bounds = array<i64: 1, 2048>}, {transform_indices = @transform_1, window_bounds = array<i64: 1, 2048>}]} {
    %c0 = arith.constant 0 : index
    %c0_0 = arith.constant 0 : index
    %0 = vector.load %arg1[%c0, %c0_0] : memref<1x2048xf32, #tpu.memory_space<vmem>>, vector<1x2048xf32>
    %cst = arith.constant 0.000000e+00 : f32
    %1 = vector.broadcast %cst : f32 to vector<1x2048xf32>
    %2 = arith.maximumf %0, %1 : vector<1x2048xf32>
    %c0_1 = arith.constant 0 : index
    %c0_2 = arith.constant 0 : index
    %3 = vector.load %arg2[%c0_1, %c0_2] : memref<1x2048xf32, #tpu.memory_space<vmem>>, vector<1x2048xf32>
    tpu.vector_store %arg2[%c0_1, %c0_2], %2 {strides = array<i32>} : memref<1x2048xf32, #tpu.memory_space<vmem>>, vector<1x2048xf32>,
    return
  }
  func.func @transform_0(%arg0: i32) -> (i32, i32) {
    %c0_i32 = arith.constant 0 : i32
    %c0_i32_0 = arith.constant 0 : i32
    return %arg0, %c0_i32 : i32, i32
  }
  func.func @transform_1(%arg0: i32) -> (i32, i32) {
    %c0_i32 = arith.constant 0 : i32
    %c0_i32_0 = arith.constant 0 : i32
    return %arg0, %c0_i32 : i32, i32
  }
}

</mosaic_0001>

<bundles_post_ra>
// kernel: tpu_custom_call.1
= control target key start
LH: loop header
LB: loop body
LE: loop exit
PB: predicated region body
PF: predicated region fallthrough
CT: control target
= control target key end

     0   :  { %6 = vsyncpa [#allocation3], 0  ;;  %s128_s0 = inlined_call_operand.hbm [shape: f32[1,2048], index: 0, kind: input, shape index: {}]   ;;  %s129_s1 = inlined_call_operand.hbm [shape: f32[1,2048], index: 1, kind: output, shape index: {}]  }
   0x1   :  { %7 = vsyncpa [#allocation4], 0  ;;  %s92_s6 = smov [#allocation2]   ;;  %s44_s10 = scalar_lea.hbm %s128_s0, 256 }
   0x2   :  { %s14_s7 = sshll.u32 %s92_s6, 4  ;;  %p45_p0 = scmp.ne.s32.totalorder %s128_s0, %s44_s10  ;;  %s15_s7 = int_to_ptr.vmem [resolvable:$true] %s14_s7 }
   0x3   :  { %p48_p1 = scmp.lt.u32.totalorder %s44_s10, %s128_s0 }
   0x5   :  { %p50_p2 = pnand %p48_p1, %p45_p0 }
   0x7   :  { %53 = shalt.err (!%p50_p2)
}
   0x8   :  { %s54_s15 = scalar_lea.vmem %s15_s7, 256  ;;  %p59_p4 = scmp.lt.s32.totalorder %s15_s7, %s15_s7 }
   0x9   :  { %p55_p3 = scmp.ne.s32.totalorder %s15_s7, %s54_s15  ;;  %p60_p5 = scmp.lt.s32.totalorder %s54_s15, %s54_s15 }
   0xb   :  { %p61_p6 = por %p60_p5, %p59_p4 }
   0xd   :  { %p62_p7 = pnand %p61_p6, %p55_p3 }
   0xf   :  { %65 = shalt.err (!%p62_p7)
}
  0x10   :  { %17 = dma.hbm_to_vmem [thread:$0]  %s128_s0, 256, %s15_s7, [#allocation3]  }
  0x11   :  { %88 = dma.done.wait [#allocation3], 256  }
  0x12   :  { %89 = vsyncadd [#allocation3], 4294967040  ;;  %s93_s18 = smov [#allocation5]   ;;  %v21_v0 = vld [vmem:[#allocation2] sm:$0xff]  ;;  %v22_v1 = vld [vmem:[#allocation2 + $0x8] sm:$0xff] }
  0x13   :  { %s33_s19 = sshll.u32 %s93_s18, 4  ;;  %v23_v2 = vmax.f32 %v21_v0, 0.0  ;;  %v24_v3 = vmax.f32 %v22_v1, 0.0  ;;  %s34_s19 = int_to_ptr.vmem [resolvable:$true] %s33_s19 }
  0x14   :  { %s66_s20 = scalar_lea.vmem %s34_s19, 256  ;;  %p71_p9 = scmp.lt.s32.totalorder %s34_s19, %s34_s19 }
  0x15   :  { %25 = vst [vmem:[#allocation5] sm:$0xff] %v23_v2  ;;  %26 = vst [vmem:[#allocation5 + $0x8] sm:$0xff] %v24_v3  ;;  %p67_p8 = scmp.ne.s32.totalorder %s34_s19, %s66_s20  ;;  %p72_p10 = scmp.lt.s32.totalorder %s66_s20, %s66_s20 }
  0x17   :  { %p73_p11 = por %p72_p10, %p71_p9 }
  0x19   :  { %p74_p12 = pnand %p73_p11, %p67_p8 }
  0x1b   :  { %77 = shalt.err (!%p74_p12)
}
  0x1c   :  { %s78_s22 = scalar_lea.hbm %s129_s1, 256 }
  0x1d   :  { %p79_p13 = scmp.ne.s32.totalorder %s129_s1, %s78_s22  ;;  %p82_p0 = scmp.lt.u32.totalorder %s78_s22, %s129_s1 }
  0x1f   :  { %p84_p1 = pnand %p82_p0, %p79_p13 }
  0x21   :  { %87 = shalt.err (!%p84_p1)
}
  0x22   :  { %36 = dma.vmem_to_hbm [thread:$0]  %s34_s19, 256, %s129_s1, [#allocation4]  }
  0x23   :  { %90 = dma.done.wait [#allocation4], 256  }
  0x24   :  { %91 = vsyncadd [#allocation4], 4294967040 }
  0x25   :  { %40 = vsyncpa [#allocation3], 1 }
  0x26   :  { %41 = vsyncpa [#allocation4], 1 }

</bundles_post_ra>
